<compile_context>
chip_gen: v6e
topology: v6e:2x2x1
jax: 0.10.0
libtpu: 0.0.40
codegen_flags: <defaults>
</compile_context>

<pallas_src>
import jax
import jax.numpy as jnp
from jax import lax
from jax.experimental import pallas as pl
from jax.experimental.pallas import tpu as pltpu


_LANES = 128
_SUBLANES = 8


def _pow_static(p, gamma):
    """p**gamma without exp/log transcendentals for small integer gamma."""
    g = float(gamma)
    if g == 1.0:
        return p
    if g.is_integer() and 1.0 < g <= 8.0:
        out = p
        for _ in range(int(g) - 1):
            out = out * p
        return out
    return jnp.power(p, g)


def _vfl_terms(p, g, l, alpha, gamma):
    """Elementwise varifocal-loss terms in f32 (shared by kernel / tail / ref)."""
    p = p.astype(jnp.float32)
    g = g.astype(jnp.float32)
    l = l.astype(jnp.float32)
    weight = float(alpha) * _pow_static(p, gamma) * (1.0 - l) + g * l
    # PyTorch binary_cross_entropy clamps log at -100 (clamp BEFORE the 0* mul).
    log_p = jnp.maximum(jnp.log(p), -100.0)
    log_1mp = jnp.maximum(jnp.log(1.0 - p), -100.0)
    bce = -(g * log_p + (1.0 - g) * log_1mp)
    return bce * weight


def _sublane_multiple(dtype):
    """Required second-minor tile multiple: 8 (32-bit), 16 (bf16), 32 (8-bit)."""
    bits = jnp.dtype(dtype).itemsize * 8
    return max(_SUBLANES, _SUBLANES * 32 // bits)


def _tpu_defaults():
    """(num_cores, tile_rows) per chip generation; conservative fallback."""
    kind = ""
    try:
        kind = jax.devices()[0].device_kind.lower()
    except Exception:
        pass
    two_tc = "v7" in kind                       # v7x: 2 TensorCores / chip
    if ("v6" in kind) or ("v7" in kind):
        tile_rows = 4096   # 12 MiB double-buffered inputs, fits 32 MiB scoped VMEM
    else:
        tile_rows = 2048   # 6 MiB double-buffered: safe under v5e's 16 MiB default
    return (2 if two_tc else 1), tile_rows


def _make_vfl_kernel(alpha, gamma, tm, rows_valid, tiles_per_core, edge_start,
                     needs_mask):
    def _accum(acc_ref, contrib):
        # Sublane-only reduction (pure VPU adds) into the (8, 128) accumulator.
        acc_ref[...] += jnp.sum(
            contrib.reshape(tm // _SUBLANES, _SUBLANES, _LANES), axis=0)

    def vfl_kernel(pred_ref, gt_ref, label_ref, out_ref, acc_ref):
        c = pl.program_id(0)   # "parallel" core axis (size 1 on 1-TC chips)
        i = pl.program_id(1)   # sequential reduction axis

        @pl.when(i == 0)
        def _init():
            acc_ref[...] = jnp.zeros_like(acc_ref)

        contrib = _vfl_terms(pred_ref[...], gt_ref[...], label_ref[...],
                             alpha, gamma)

        if needs_mask:
            tile_idx = c * tiles_per_core + i

            # Steady-state tiles: mask-free accumulate (no iota/cmp/select).
            @pl.when(tile_idx < edge_start)
            def _steady():
                _accum(acc_ref, contrib)

            # Edge tiles (ragged last tile / clamped duplicate): select (not
            # multiply) rows past the real end so OOB garbage/NaNs never
            # reach the accumulator.
            @pl.when(tile_idx >= edge_start)
            def _edge():
                row = tile_idx * tm + lax.broadcasted_iota(
                    jnp.int32, (tm, _LANES), 0)
                _accum(acc_ref, jnp.where(row < rows_valid, contrib, 0.0))
        else:
            _accum(acc_ref, contrib)

        # Single cross-lane reduce + SMEM scalar store, once per core.
        @pl.when(i == pl.num_programs(1) - 1)
        def _finalize():
            out_ref[0, 0] = jnp.sum(acc_ref[...])

    return vfl_kernel


def varifocal_loss(pred_score, gt_score, label, alpha=0.75, gamma=2.0,
                   tile_rows=None, num_cores=None):
    """Pallas implementation of VarifocalLoss.forward. Returns a f32 scalar.

    Inputs may be f32 or bf16 (the kernel upcasts to f32 internally, matching
    the torch autocast(enabled=False) float path of the reference module).
    """
    assert pred_score.shape == gt_score.shape == label.shape

    total = int(pred_score.size)
    if total == 0:
        return jnp.float32(0.0)

    auto_cores, auto_rows = _tpu_defaults()
    if num_cores is None:
        num_cores = auto_cores
    if tile_rows is None:
        tile_rows = auto_rows

    # Sublane multiple needed by the widest-packed input dtype.
    mult = max(_sublane_multiple(x.dtype) for x in (pred_score, gt_score, label))
    tile_rows = max(mult, ((int(tile_rows) + mult - 1) // mult) * mult)

    pf = pred_score.reshape(-1)
    gf = gt_score.reshape(-1)
    lf = label.reshape(-1)

    rows = total // _LANES
    if rows < mult:
        # Too small for even one native tile: just do it in plain JAX.
        return jnp.sum(_vfl_terms(pf, gf, lf, alpha, gamma))

    aligned = rows * _LANES
    tail = total - aligned
    if tail == 0:
        # Common case (anchors*classes multiple of 128): a pure reshape, which
        # XLA keeps as a zero-copy bitcast -- no extra HBM traffic.
        p2 = pf.reshape(rows, _LANES)
        g2 = gf.reshape(rows, _LANES)
        l2 = lf.reshape(rows, _LANES)
    else:
        # Rare case: 128-aligned prefix for the kernel, <128-element tail in
        # plain JAX (no full-size pad copy of all three arrays).
        p2 = pf[:aligned].reshape(rows, _LANES)
        g2 = gf[:aligned].reshape(rows, _LANES)
        l2 = lf[:aligned].reshape(rows, _LANES)

    tm = min(tile_rows, (rows // mult) * mult)        # valid tile height <= rows
    tiles_total = pl.cdiv(rows, tm)
    num_cores = max(1, min(int(num_cores), tiles_total))
    tiles_per_core = pl.cdiv(tiles_total, num_cores)
    edge_start = rows // tm            # first logical tile that overhangs the array
    duplicated = num_cores * tiles_per_core != tiles_total
    needs_mask = (tiles_total * tm != rows) or duplicated

    if duplicated:
        # Clamp so the duplicated tail tile's DMA stays in bounds; its rows are
        # zeroed by the in-kernel edge mask.
        def in_index_map(c, i):
            return (jnp.minimum(c * tiles_per_core + i, tiles_total - 1), 0)
    else:
        def in_index_map(c, i):
            return (c * tiles_per_core + i, 0)

    kernel = _make_vfl_kernel(alpha, gamma, tm, rows, tiles_per_core,
                              edge_start, needs_mask)
    in_spec = pl.BlockSpec((tm, _LANES), in_index_map)

    out = pl.pallas_call(
        kernel,
        out_shape=jax.ShapeDtypeStruct((num_cores, 1), jnp.float32),
        grid_spec=pltpu.PrefetchScalarGridSpec(
            num_scalar_prefetch=0,
            grid=(num_cores, tiles_per_core),
            in_specs=[in_spec, in_spec, in_spec],
            out_specs=pl.BlockSpec((1, 1), lambda c, i: (c, 0),
                                   memory_space=pltpu.SMEM),
            scratch_shapes=[pltpu.VMEM((_SUBLANES, _LANES), jnp.float32)],
        ),
        compiler_params=pltpu.CompilerParams(
            dimension_semantics=("parallel", "arbitrary"),
        ),
    )(p2, g2, l2)

    loss = jnp.sum(out)
    if tail:
        loss = loss + jnp.sum(
            _vfl_terms(pf[aligned:], gf[aligned:], lf[aligned:], alpha, gamma))
    return loss


def varifocal_loss_ref(pred_score, gt_score, label, alpha=0.75, gamma=2.0):
    """Pure-JAX reference for correctness checking."""
    return jnp.sum(_vfl_terms(pred_score.reshape(-1), gt_score.reshape(-1),
                              label.reshape(-1), alpha, gamma))


def _make_inputs(key, shape, dtype=jnp.float32):
    k1, k2, k3 = jax.random.split(key, 3)
    # pred_score: post-sigmoid classification score in (0, 1)
    pred = jax.nn.sigmoid(jax.random.normal(k1, shape, jnp.float32))
    # gt_score: IoU-weighted target in [0, 1]; label: binary indicator
    gt = jax.random.uniform(k2, shape, jnp.float32)
    lab = (jax.random.uniform(k3, shape) > 0.9).astype(jnp.float32)
    gt = gt * lab   # gt_score nonzero only where label is set (YOLOv6 usage)
    return pred.astype(dtype), gt.astype(dtype), lab.astype(dtype)


if __name__ == "__main__":
    key = jax.random.PRNGKey(0)
    k1, k2, k3 = jax.random.split(key, 3)

    checks = []

    # 1) (batch, n_anchors, n_classes) with anchors*classes a multiple of 128:
    #    zero-copy reshape path + pl.when-gated ragged last tile.
    p, g, l = _make_inputs(k1, (2, 84, 80))
    checks.append((varifocal_loss(p, g, l), varifocal_loss_ref(p, g, l)))

    # 2) Awkward size (total % 128 != 0): kernel on aligned prefix + JAX tail.
    p2_, g2_, l2_ = _make_inputs(k2, (2, 61, 33))
    checks.append((varifocal_loss(p2_, g2_, l2_),
                   varifocal_loss_ref(p2_, g2_, l2_)))

    # 3) Tiny forced tiles + 2-core grid: exercises the clamped duplicate tile
    #    and the edge-mask branch.
    p3_, g3_, l3_ = _make_inputs(k3, (2, 84, 80))
    checks.append((varifocal_loss(p3_, g3_, l3_, tile_rows=16, num_cores=2),
                   varifocal_loss_ref(p3_, g3_, l3_)))

    # 4) bf16 inputs (kernel upcasts internally; halves HBM traffic).
    pb, gb, lb = (x.astype(jnp.bfloat16) for x in (p3_, g3_, l3_))
    checks.append((varifocal_loss(pb, gb, lb), varifocal_loss_ref(pb, gb, lb)))

    for got, want in checks:
        got = jax.block_until_ready(got)
        assert jnp.allclose(got, want, rtol=1e-4, atol=1e-2), (got, want)

    print("KERNEL_OK")
</pallas_src>

<mosaic_0001>
module attributes {stable_mosaic.version = 11 : i64} {
  func.func @vfl_kernel(%arg0: i32, %arg1: i32, %arg2: memref<104x128xf32, #tpu.memory_space<vmem>>, %arg3: memref<104x128xf32, #tpu.memory_space<vmem>>, %arg4: memref<104x128xf32, #tpu.memory_space<vmem>>, %arg5: memref<1x1xf32, #tpu.memory_space<smem>>, %arg6: memref<8x128xf32, #tpu.memory_space<vmem>>) attributes {dimension_semantics = [#tpu.dimension_semantics<parallel>, #tpu.dimension_semantics<arbitrary>], iteration_bounds = array<i64: 1, 2>, scalar_prefetch = 0 : i64, scratch_operands = 1 : i64, tpu.core_type = #tpu.core_type<tc>, window_params = [{transform_indices = @transform_0, window_bounds = array<i64: 104, 128>}, {transform_indices = @transform_1, window_bounds = array<i64: 104, 128>}, {transform_indices = @transform_2, window_bounds = array<i64: 104, 128>}, {transform_indices = @transform_3, window_bounds = array<i64: 1, 1>}]} {
    %c0_i32 = arith.constant 0 : i32
    %0 = arith.cmpi eq, %arg1, %c0_i32 : i32
    %1 = arith.extui %0 : i1 to i32
    %c0_i32_0 = arith.constant 0 : i32
    %2 = arith.cmpi ne, %1, %c0_i32_0 : i32
    scf.if %2 {
      %cst_17 = arith.constant 0.000000e+00 : f32
      %41 = vector.broadcast %cst_17 : f32 to vector<8x128xf32>
      %c0_18 = arith.constant 0 : index
      %c0_19 = arith.constant 0 : index
      %42 = vector.load %arg6[%c0_18, %c0_19] : memref<8x128xf32, #tpu.memory_space<vmem>>, vector<8x128xf32>
      tpu.vector_store %arg6[%c0_18, %c0_19], %41 {strides = array<i32>} : memref<8x128xf32, #tpu.memory_space<vmem>>, vector<8x128xf32>,
    } else {
    }
    %c0 = arith.constant 0 : index
    %c0_1 = arith.constant 0 : index
    %3 = vector.load %arg2[%c0, %c0_1] : memref<104x128xf32, #tpu.memory_space<vmem>>, vector<104x128xf32>
    %c0_2 = arith.constant 0 : index
    %c0_3 = arith.constant 0 : index
    %4 = vector.load %arg3[%c0_2, %c0_3] : memref<104x128xf32, #tpu.memory_space<vmem>>, vector<104x128xf32>
    %c0_4 = arith.constant 0 : index
    %c0_5 = arith.constant 0 : index
    %5 = vector.load %arg4[%c0_4, %c0_5] : memref<104x128xf32, #tpu.memory_space<vmem>>, vector<104x128xf32>
    %6 = arith.mulf %3, %3 : vector<104x128xf32>
    %cst = arith.constant 7.500000e-01 : f32
    %7 = vector.broadcast %cst : f32 to vector<104x128xf32>
    %8 = arith.mulf %7, %6 : vector<104x128xf32>
    %cst_6 = arith.constant 1.000000e+00 : f32
    %9 = vector.broadcast %cst_6 : f32 to vector<104x128xf32>
    %10 = arith.subf %9, %5 : vector<104x128xf32>
    %11 = arith.mulf %8, %10 : vector<104x128xf32>
    %12 = arith.mulf %4, %5 : vector<104x128xf32>
    %13 = arith.addf %11, %12 : vector<104x128xf32>
    %14 = math.log %3 : vector<104x128xf32>
    %cst_7 = arith.constant -1.000000e+02 : f32
    %15 = vector.broadcast %cst_7 : f32 to vector<104x128xf32>
    %16 = arith.maximumf %14, %15 : vector<104x128xf32>
    %cst_8 = arith.constant 1.000000e+00 : f32
    %17 = vector.broadcast %cst_8 : f32 to vector<104x128xf32>
    %18 = arith.subf %17, %3 : vector<104x128xf32>
    %19 = math.log %18 : vector<104x128xf32>
    %cst_9 = arith.constant -1.000000e+02 : f32
    %20 = vector.broadcast %cst_9 : f32 to vector<104x128xf32>
    %21 = arith.maximumf %19, %20 : vector<104x128xf32>
    %22 = arith.mulf %4, %16 : vector<104x128xf32>
    %cst_10 = arith.constant 1.000000e+00 : f32
    %23 = vector.broadcast %cst_10 : f32 to vector<104x128xf32>
    %24 = arith.subf %23, %4 : vector<104x128xf32>
    %25 = arith.mulf %24, %21 : vector<104x128xf32>
    %26 = arith.addf %22, %25 : vector<104x128xf32>
    %cst_11 = arith.constant 0.000000e+00 : f32
    %27 = vector.broadcast %cst_11 : f32 to vector<104x128xf32>
    %28 = arith.subf %27, %26 : vector<104x128xf32>
    %29 = arith.mulf %28, %13 : vector<104x128xf32>
    %c2_i32 = arith.constant 2 : i32
    %30 = arith.muli %arg0, %c2_i32 : i32
    %31 = arith.addi %30, %arg1 : i32
    %c1_i32 = arith.constant 1 : i32
    %32 = arith.cmpi slt, %31, %c1_i32 : i32
    %33 = arith.extui %32 : i1 to i32
    %c0_i32_12 = arith.constant 0 : i32
    %34 = arith.cmpi ne, %33, %c0_i32_12 : i32
    scf.if %34 {
      %c0_17 = arith.constant 0 : index
      %c0_18 = arith.constant 0 : index
      %41 = vector.load %arg6[%c0_17, %c0_18] : memref<8x128xf32, #tpu.memory_space<vmem>>, vector<8x128xf32>
      %42 = vector.shape_cast %29 : vector<104x128xf32> to vector<13x8x128xf32>
      %cst_19 = arith.constant dense<0.000000e+00> : vector<8x128xf32>
      %43 = vector.multi_reduction <add>, %42, %cst_19 [0] : vector<13x8x128xf32> to vector<8x128xf32>
      %44 = arith.addf %41, %43 : vector<8x128xf32>
      %c0_20 = arith.constant 0 : index
      %c0_21 = arith.constant 0 : index
      %45 = vector.load %arg6[%c0_20, %c0_21] : memref<8x128xf32, #tpu.memory_space<vmem>>, vector<8x128xf32>
      tpu.vector_store %arg6[%c0_20, %c0_21], %44 {strides = array<i32>} : memref<8x128xf32, #tpu.memory_space<vmem>>, vector<8x128xf32>,
    } else {
    }
    %c1_i32_13 = arith.constant 1 : i32
    %35 = arith.cmpi sge, %31, %c1_i32_13 : i32
    %36 = arith.extui %35 : i1 to i32
    %c0_i32_14 = arith.constant 0 : i32
    %37 = arith.cmpi ne, %36, %c0_i32_14 : i32
    scf.if %37 {
      %c104_i32 = arith.constant 104 : i32
      %41 = arith.muli %31, %c104_i32 : i32
      %42 = tpu.iota {dimensions = array<i32: 0>} : vector<104x128xi32>
      %43 = vector.broadcast %41 : i32 to vector<104x128xi32>
      %44 = arith.addi %43, %42 : vector<104x128xi32>
      %c105_i32 = arith.constant 105 : i32
      %45 = vector.broadcast %c105_i32 : i32 to vector<104x128xi32>
      %46 = arith.cmpi slt, %44, %45 : vector<104x128xi32>
      %cst_17 = arith.constant 0.000000e+00 : f32
      %47 = vector.broadcast %cst_17 : f32 to vector<104x128xf32>
      %48 = arith.select %46, %29, %47 : vector<104x128xi1>, vector<104x128xf32>
      %c0_18 = arith.constant 0 : index
      %c0_19 = arith.constant 0 : index
      %49 = vector.load %arg6[%c0_18, %c0_19] : memref<8x128xf32, #tpu.memory_space<vmem>>, vector<8x128xf32>
      %50 = vector.shape_cast %48 : vector<104x128xf32> to vector<13x8x128xf32>
      %cst_20 = arith.constant dense<0.000000e+00> : vector<8x128xf32>
      %51 = vector.multi_reduction <add>, %50, %cst_20 [0] : vector<13x8x128xf32> to vector<8x128xf32>
      %52 = arith.addf %49, %51 : vector<8x128xf32>
      %c0_21 = arith.constant 0 : index
      %c0_22 = arith.constant 0 : index
      %53 = vector.load %arg6[%c0_21, %c0_22] : memref<8x128xf32, #tpu.memory_space<vmem>>, vector<8x128xf32>
      tpu.vector_store %arg6[%c0_21, %c0_22], %52 {strides = array<i32>} : memref<8x128xf32, #tpu.memory_space<vmem>>, vector<8x128xf32>,
    } else {
    }
    %c1_i32_15 = arith.constant 1 : i32
    %38 = arith.cmpi eq, %arg1, %c1_i32_15 : i32
    %39 = arith.extui %38 : i1 to i32
    %c0_i32_16 = arith.constant 0 : i32
    %40 = arith.cmpi ne, %39, %c0_i32_16 : i32
    scf.if %40 {
      %c0_17 = arith.constant 0 : index
      %c0_18 = arith.constant 0 : index
      %41 = vector.load %arg6[%c0_17, %c0_18] : memref<8x128xf32, #tpu.memory_space<vmem>>, vector<8x128xf32>
      %42 = vector.shape_cast %41 : vector<8x128xf32> to vector<1x8x128xf32>
      %cst_19 = arith.constant dense<0.000000e+00> : vector<1xf32>
      %43 = vector.multi_reduction <add>, %42, %cst_19 [1, 2] : vector<1x8x128xf32> to vector<1xf32>
      %44 = vector.shape_cast %43 : vector<1xf32> to vector<1x1x1xf32>
      %45 = vector.extract %44[0, 0, 0] : f32 from vector<1x1x1xf32>
      %c0_20 = arith.constant 0 : index
      %c0_21 = arith.constant 0 : index
      %46 = memref.load %arg5[%c0_20, %c0_21] : memref<1x1xf32, #tpu.memory_space<smem>>
      memref.store %45, %arg5[%c0_20, %c0_21] : memref<1x1xf32, #tpu.memory_space<smem>>
    } else {
    }
    return
  }
  func.func @transform_0(%arg0: i32, %arg1: i32) -> (i32, i32) {
    %c2_i32 = arith.constant 2 : i32
    %0 = arith.muli %arg0, %c2_i32 : i32
    %1 = arith.addi %0, %arg1 : i32
    %c0_i32 = arith.constant 0 : i32
    %c0_i32_0 = arith.constant 0 : i32
    return %1, %c0_i32 : i32, i32
  }
  func.func @transform_1(%arg0: i32, %arg1: i32) -> (i32, i32) {
    %c2_i32 = arith.constant 2 : i32
    %0 = arith.muli %arg0, %c2_i32 : i32
    %1 = arith.addi %0, %arg1 : i32
    %c0_i32 = arith.constant 0 : i32
    %c0_i32_0 = arith.constant 0 : i32
    return %1, %c0_i32 : i32, i32
  }
  func.func @transform_2(%arg0: i32, %arg1: i32) -> (i32, i32) {
    %c2_i32 = arith.constant 2 : i32
    %0 = arith.muli %arg0, %c2_i32 : i32
    %1 = arith.addi %0, %arg1 : i32
    %c0_i32 = arith.constant 0 : i32
    %c0_i32_0 = arith.constant 0 : i32
    return %1, %c0_i32 : i32, i32
  }
  func.func @transform_3(%arg0: i32, %arg1: i32) -> (i32, i32) {
    %c0_i32 = arith.constant 0 : i32
    %c0_i32_0 = arith.constant 0 : i32
    return %arg0, %c0_i32 : i32, i32
  }
}

</mosaic_0001>

<bundles_post_ra>
// kernel: tpu_custom_call.1
= control target key start
LH: loop header
LB: loop body
LE: loop exit
PB: predicated region body
PF: predicated region fallthrough
CT: control target
= control target key end

     0   :  { %8 = vsyncpa [#allocation4], 0  ;;  %s1709_s0 = inlined_call_operand.hbm [shape: f32[105,128], index: 0, kind: input, shape index: {}]   ;;  %s1710_s1 = inlined_call_operand.hbm [shape: f32[105,128], index: 1, kind: input, shape index: {}]   ;;  %s1711_s2 = inlined_call_operand.hbm [shape: f32[105,128], index: 2, kind: input, shape index: {}]   ;;  %s1712_s3 = inlined_call_operand.hbm [shape: f32[1,1], index: 3, kind: output, shape index: {}]  }
   0x1   :  { %10 = vsyncpa [#allocation4 + $0x1], 0 }
   0x2   :  { %11 = vsyncpa [#allocation7], 0 }
   0x3   :  { %13 = vsyncpa [#allocation7 + $0x1], 0 }
   0x4   :  { %14 = vsyncpa [#allocation5], 0  ;;  %s1180_s12 = smov 0   ;;  %s1182_s13 = smov 0  }
   0x5   :  { %s1184_s14 = smov 0   ;;  %s1186_s15 = smov 0  }
   0x6   :  { %s1188_s16 = smov 0   ;;  %s1190_s17 = smov 0  }
   0x7 LB: > { %s1209_s18 = sadd.s32 4294967295, %s1147_s17   ;;  %s29_s19 = sadd.s32 1, %s1143_s16  ;;  %s1147_s17 = sphi %s1190_s17, %s20_s17   ;;  %s1143_s16 = sphi %s1188_s16, %s1737_s16   ;;  %s1139_s15 = sphi %s1186_s15, %s1736_s15   ;;  %s1135_s14 = sphi %s1184_s14, %s1735_s14   ;;  %s1131_s13 = sphi %s1182_s13, %s1734_s13   ;;  %s1127_s12 = sphi %s1180_s12, %s1733_s12  }
   0x8   : > { %p30_p0 = scmp.ge.s32.totalorder %s29_s19, 2  ;;  %s43_s20 = sadd.s32 1, %s1135_s14 }
   0x9   : > { %p50_p1 = scmp.ne.s32.totalorder %s1135_s14, %s1131_s13  ;;  %p51_p2 = scmp.eq.s32.totalorder %s1147_s17, 0 }
   0xa   : > { %s1739_s19 = smov (%p30_p0, %s29_s19), 0  ;;  %p56_p4 = scmp.ne.s32.totalorder %s1131_s13, %s1127_s12 }
   0xb   : > { %p1218_p3 = por %p51_p2, %p50_p1  ;;  %s40_s22 = ssub.s32 %s1143_s16, %s1739_s19 }
   0xc   : > { %p57_p5 = scmp.eq.s32.totalorder %s1209_s18, 0  ;;  %p41_p6 = scmp.eq.s32.totalorder %s40_s22, 0 }
   0xd   : > { %p850_p8 = scmp.ge.s32.totalorder %s1147_s17, 2 }
   0xe   : > { %p1226_p7 = por %p57_p5, %p56_p4 }
   0xf   : > { %s1231_s24 = scalar_select %p41_p6, %s1135_s14, %s43_s20  }
  0x10   : > { %162 = sbr.rel (%p850_p8) target bundleno = 123 (0x7b), region = 16 }
  0x15   : > { %165 = sbr.rel (!%p1218_p3) target bundleno = 55 (0x37), region = 20  ;;  %s166_s25 = sand.u32 (%p1218_p3), 1, %s1135_s14  }
  0x16   : > { %s173_s26 = smul.u32 (%p1218_p3), 13, %s1143_s16  ;;  %s1241_s4 = scalar_lea.sflag (%p1218_p3), [#allocation4], %s166_s25 }
  0x17   : > { %s878_s27 = smul.u32 (%p1218_p3), 104, %s166_s25 }
  0x18   : > { %s174_s28 = ssub.s32 (%p1218_p3), 14, %s173_s26 }
  0x19   : > { %p175_p9 = scmp.lt.s32.totalorder (%p1218_p3), %s174_s28, 13  ;;  %s170_s5 = scalar_lea.vmem (%p1218_p3), [#allocation3], %s878_s27 }
  0x1b   : > { %s1741_s28 = smov (!%p175_p9, %s174_s28), 13 }
  0x1c   : > { %s1238_s29 = sshll.u32 %s1741_s28, 7 }
  0x1d   : > { %s179_s30 = ssub.s32 1664, %s1238_s29 }
  0x1e   : > { %180 = vsyncadd %s1241_s4, %s179_s30  ;;  %p852_p10 = scmp.ne.s32.totalorder %s1238_s29, 0  ;;  %s875_s6 = smul.u32 1664, %s1143_s16 }
  0x1f   : > { %s185_s7 = sshll.u32 %s170_s5, 4  ;;  %s1005_s22 = scalar_lea.hbm %s1709_s0, 1792  ;;  %s1251_s7 = int_to_ptr.vmem [resolvable:$true] %s185_s7 }
  0x20   : > { %s1249_s10 = scalar_lea.hbm %s1709_s0, %s875_s6 }
  0x21   : > { %s1001_s11 = scalar_lea.hbm %s1249_s10, %s1238_s29 }
  0x22   : > { %p1002_p11 = scmp.ne.s32.totalorder %s1249_s10, %s1001_s11  ;;  %p1007_p0 = scmp.lt.s32.totalorder %s1005_s22, %s1001_s11 }
  0x24   : > { %p1003_p12 = pnand %p1002_p11, %p852_p10 }
  0x26   : > { %p1004_p13 = pneg %p1003_p12 }
  0x28   : > { %p1009_p1 = pnand %p1007_p0, %p1004_p13 }
  0x2a   : > { %1012 = shalt.err (!%p1009_p1)
}
  0x2b   : > { %s1013_s25 = scalar_lea.vmem %s1251_s7, %s1238_s29  ;;  %s1149_s26 = smov [#allocation3]  }
  0x2c   : > { %p1014_p2 = scmp.ne.s32.totalorder %s1251_s7, %s1013_s25  ;;  %s1017_s27 = sshll.u32 %s1149_s26, 4  ;;  %s1018_s27 = int_to_ptr.vmem [resolvable:$false] %s1017_s27 }
  0x2d   : > { %s1019_s28 = scalar_lea.vmem %s1018_s27, 3328  ;;  %p1020_p6 = scmp.lt.s32.totalorder %s1251_s7, %s1018_s27 }
  0x2e   : > { %p1015_p4 = pnand %p1014_p2, %p852_p10  ;;  %p1021_p8 = scmp.lt.s32.totalorder %s1019_s28, %s1013_s25 }
  0x30   : > { %p1016_p5 = pneg %p1015_p4  ;;  %p1022_p9 = por %p1021_p8, %p1020_p6 }
  0x32   : > { %p1023_p11 = pnand %p1022_p9, %p1016_p5 }
  0x34   : > { %1026 = shalt.err (!%p1023_p11)
}
  0x35   : > { %s1150_s30 = smov 128   ;;  %s1151_s5 = smov 8  }
  0x36   : > { %191 = dma.hbm_to_vmem [thread:$0]  (%p852_p10), %s1249_s10, %s1238_s29, %s1251_s7, %s1241_s4, %s1150_s30, %s1150_s30, %s1151_s5  }
  0x37 PF: > { %194 = sbr.rel (!%p1218_p3) target bundleno = 89 (0x59), region = 24  ;;  %s195_s6 = sand.u32 (%p1218_p3), 1, %s1147_s17  }
  0x38   : > { %s197_s8 = sand.u32 (%p1218_p3), 1, %s1135_s14   ;;  %s202_s11 = smul.u32 (%p1218_p3), 13, %s1143_s16 }
  0x39   : > { %s879_s9 = smul.u32 (%p1218_p3), 104, %s197_s8  ;;  %s1281_s25 = scalar_lea.sflag (%p1218_p3), [#allocation7], %s195_s6 }
  0x3a   : > { %s203_s12 = ssub.s32 (%p1218_p3), 14, %s202_s11 }
  0x3b   : > { %p204_p12 = scmp.lt.s32.totalorder (%p1218_p3), %s203_s12, 13  ;;  %s199_s29 = scalar_lea.vmem (%p1218_p3), [#allocation6], %s879_s9 }
  0x3d   : > { %s1743_s12 = smov (!%p204_p12, %s203_s12), 13 }
  0x3e   : > { %s1278_s20 = sshll.u32 %s1743_s12, 7 }
  0x3f   : > { %s208_s22 = ssub.s32 1664, %s1278_s20 }
  0x40   : > { %209 = vsyncadd %s1281_s25, %s208_s22  ;;  %p857_p10 = scmp.ne.s32.totalorder %s1278_s20, 0  ;;  %s876_s4 = smul.u32 1664, %s1143_s16 }
  0x41   : > { %s214_s7 = sshll.u32 %s199_s29, 4  ;;  %s1031_s6 = scalar_lea.hbm %s1710_s1, 1792  ;;  %s1291_s7 = int_to_ptr.vmem [resolvable:$true] %s214_s7 }
  0x42   : > { %s1289_s27 = scalar_lea.hbm %s1710_s1, %s876_s4 }
  0x43   : > { %s1027_s28 = scalar_lea.hbm %s1289_s27, %s1278_s20 }
  0x44   : > { %p1028_p13 = scmp.ne.s32.totalorder %s1289_s27, %s1027_s28  ;;  %p1033_p2 = scmp.lt.s32.totalorder %s1031_s6, %s1027_s28 }
  0x46   : > { %p1029_p0 = pnand %p1028_p13, %p857_p10 }
  0x48   : > { %p1030_p1 = pneg %p1029_p0 }
  0x4a   : > { %p1035_p4 = pnand %p1033_p2, %p1030_p1 }
  0x4c   : > { %1038 = shalt.err (!%p1035_p4)
}
  0x4d   : > { %s1039_s8 = scalar_lea.vmem %s1291_s7, %s1278_s20  ;;  %s1152_s9 = smov [#allocation6]  }
  0x4e   : > { %p1040_p5 = scmp.ne.s32.totalorder %s1291_s7, %s1039_s8  ;;  %s1043_s11 = sshll.u32 %s1152_s9, 4  ;;  %s1044_s11 = int_to_ptr.vmem [resolvable:$false] %s1043_s11 }
  0x4f   : > { %s1045_s12 = scalar_lea.vmem %s1044_s11, 3328  ;;  %p1046_p9 = scmp.lt.s32.totalorder %s1291_s7, %s1044_s11 }
  0x50   : > { %p1041_p6 = pnand %p1040_p5, %p857_p10  ;;  %p1047_p11 = scmp.lt.s32.totalorder %s1045_s12, %s1039_s8 }
  0x52   : > { %p1042_p8 = pneg %p1041_p6  ;;  %p1048_p12 = por %p1047_p11, %p1046_p9 }
  0x54   : > { %p1049_p13 = pnand %p1048_p12, %p1042_p8 }
  0x56   : > { %1052 = shalt.err (!%p1049_p13)
}
  0x57   : > { %s1153_s22 = smov 128   ;;  %s1154_s29 = smov 8  }
  0x58   : > { %220 = dma.hbm_to_vmem [thread:$0]  (%p857_p10), %s1289_s27, %s1278_s20, %s1291_s7, %s1281_s25, %s1153_s22, %s1153_s22, %s1154_s29  }
  0x59 PF: > { %223 = sbr.rel (!%p1218_p3) target bundleno = 123 (0x7b), region = 28  ;;  %s224_s4 = sand.u32 (%p1218_p3), 1, %s1147_s17  }
  0x5a   : > { %s226_s10 = sand.u32 (%p1218_p3), 1, %s1135_s14   ;;  %s231_s28 = smul.u32 (%p1218_p3), 13, %s1143_s16 }
  0x5b   : > { %s880_s26 = smul.u32 (%p1218_p3), 104, %s226_s10  ;;  %s1321_s8 = scalar_lea.sflag (%p1218_p3), [#allocation7], %s224_s4 }
  0x5c   : > { %s232_s30 = ssub.s32 (%p1218_p3), 14, %s231_s28 }
  0x5d   : > { %p233_p0 = scmp.lt.s32.totalorder (%p1218_p3), %s232_s30, 13  ;;  %s228_s20 = scalar_lea.vmem (%p1218_p3), [#allocation8], %s880_s26 }
  0x5f   : > { %s1745_s30 = smov (!%p233_p0, %s232_s30), 13 }
  0x60   : > { %s1318_s5 = sshll.u32 %s1745_s30, 7 }
  0x61   : > { %s237_s6 = ssub.s32 1664, %s1318_s5 }
  0x62   : > { %238 = vsyncadd %s1321_s8, %s237_s6  ;;  %p862_p3 = scmp.ne.s32.totalorder %s1318_s5, 0  ;;  %s877_s21 = smul.u32 1664, %s1143_s16 }
  0x63   : > { %s243_s25 = sshll.u32 %s228_s20, 4  ;;  %s1057_s29 = scalar_lea.hbm %s1711_s2, 1792  ;;  %s1331_s25 = int_to_ptr.vmem [resolvable:$true] %s243_s25 }
  0x64   : > { %s1329_s9 = scalar_lea.hbm %s1711_s2, %s877_s21 }
  0x65   : > { %s1053_s11 = scalar_lea.hbm %s1329_s9, %s1318_s5 }
  0x66   : > { %p1054_p10 = scmp.ne.s32.totalorder %s1329_s9, %s1053_s11  ;;  %p1059_p4 = scmp.lt.s32.totalorder %s1057_s29, %s1053_s11 }
  0x68   : > { %p1055_p1 = pnand %p1054_p10, %p862_p3 }
  0x6a   : > { %p1056_p2 = pneg %p1055_p1 }
  0x6c   : > { %p1061_p5 = pnand %p1059_p4, %p1056_p2 }
  0x6e   : > { %1064 = shalt.err (!%p1061_p5)
}
  0x6f   : > { %s1065_s4 = scalar_lea.vmem %s1331_s25, %s1318_s5  ;;  %s1155_s10 = smov [#allocation8]  }
  0x70   : > { %p1066_p6 = scmp.ne.s32.totalorder %s1331_s25, %s1065_s4  ;;  %s1069_s26 = sshll.u32 %s1155_s10, 4  ;;  %s1070_s26 = int_to_ptr.vmem [resolvable:$false] %s1069_s26 }
  0x71   : > { %s1071_s28 = scalar_lea.vmem %s1070_s26, 3328  ;;  %p1072_p11 = scmp.lt.s32.totalorder %s1331_s25, %s1070_s26 }
  0x72   : > { %p1067_p8 = pnand %p1066_p6, %p862_p3  ;;  %p1073_p12 = scmp.lt.s32.totalorder %s1071_s28, %s1065_s4 }
  0x74   : > { %p1068_p9 = pneg %p1067_p8  ;;  %p1074_p13 = por %p1073_p12, %p1072_p11 }
  0x76   : > { %p1075_p0 = pnand %p1074_p13, %p1068_p9 }
  0x78   : > { %1078 = shalt.err (!%p1075_p0)
}
  0x79   : > { %s1156_s30 = smov 128   ;;  %s1157_s6 = smov 8  }
  0x7a   : > { %249 = dma.hbm_to_vmem [thread:$0]  (%p862_p3), %s1329_s9, %s1318_s5, %s1331_s25, %s1321_s8, %s1156_s30, %s1156_s30, %s1157_s6  }
  0x7b PF: > { %p866_p10 = scmp.ge.s32.totalorder %s1147_s17, 1  ;;  %p251_p1 = scmp.lt.s32.totalorder %s1147_s17, 3 }
  0x7d   : > { %p252_p2 = pnand %p866_p10, %p251_p1 }
  0x7f   : > { %255 = sbr.rel (%p252_p2) target bundleno = 503 (0x1f7), region = 32 }
  0x84   : > { %s257_s20 = sand.u32 1, %s1131_s13  }
  0x85   : > { %s881_s21 = smul.u32 104, %s257_s20  ;;  %s258_s7 = scalar_lea.sflag [#allocation4], %s257_s20 }
  0x87   : > { %s1356_s27 = scalar_lea.vmem [#allocation3], %s881_s21 }
  0x88   : > { %1114 = dma.done.wait (%p1226_p7), %s258_s7, 1664  }
  0x89   : > { %1116 = vsyncadd (%p1226_p7), %s258_s7, 4294965632  ;;  %s266_s5 = sand.u32 1, %s1209_s18   ;;  %s1363_s25 = scalar_lea.vmem [#allocation6], %s881_s21 }
  0x8a   : > { %s267_s8 = scalar_lea.sflag [#allocation7], %s266_s5 }
  0x8b   : > { %1118 = dma.done.wait (%p1226_p7), %s267_s8, 3328  }
  0x8c   : > { %1120 = vsyncadd (%p1226_p7), %s267_s8, 4294963968  ;;  %s1369_s9 = scalar_lea.vmem [#allocation8], %s881_s21  ;;  %p867_p3 = scmp.ne.s32.totalorder %s1139_s15, 0 }
  0x8e   : > { %331 = sbr.rel (%p867_p3) target bundleno = 149 (0x95), region = 48 }
  0x93   : > { %v1158_v0 = vmov 0.0  }
  0x94   : > { %332 = vst [vmem:[#allocation2] sm:$0xff] %v1158_v0 }
  0x95 PF: > { %v1373_v1 = vld [vmem:[%s1356_s27] sm:$0xff]  ;;  %v1376_v2 = vld [vmem:[%s1356_s27 + $0x8] sm:$0xff]  ;;  %v1379_v3 = vld [vmem:[%s1356_s27 + $0x10] sm:$0xff]  ;;  %p868_p7 = scmp.ge.s32.totalorder %s1139_s15, 1 }
  0x96   : > { %v1382_v4 = vld [vmem:[%s1356_s27 + $0x18] sm:$0xff]  ;;  %v1385_v5 = vld [vmem:[%s1356_s27 + $0x20] sm:$0xff]  ;;  %v372_v6 = vmul.f32 %v1373_v1, %v1373_v1  ;;  %v373_v7 = vmul.f32 %v1376_v2, %v1376_v2  ;;  %v1392_v8 = vld [vmem:[%s1356_s27 + $0x28] sm:$0xff]  ;;  %v374_v11 = vmul.f32 %v1379_v3, %v1379_v3  ;;  %949 = vlog2.f32 %v1373_v1 }
  0x97   : > { %v1395_v9 = vld [vmem:[%s1356_s27 + $0x30] sm:$0xff]  ;;  %v1398_v10 = vld [vmem:[%s1356_s27 + $0x38] sm:$0xff]  ;;  %v375_v12 = vmul.f32 %v1382_v4, %v1382_v4  ;;  %v376_v13 = vmul.f32 %v1385_v5, %v1385_v5  ;;  %v1407_v14 = vld [vmem:[%s1356_s27 + $0x40] sm:$0xff]  ;;  %v377_v17 = vmul.f32 %v1392_v8, %v1392_v8  ;;  %951 = vlog2.f32 %v1376_v2 }
  0x98   : > { %v1410_v15 = vld [vmem:[%s1356_s27 + $0x48] sm:$0xff]  ;;  %v1413_v16 = vld [vmem:[%s1356_s27 + $0x50] sm:$0xff]  ;;  %v378_v18 = vmul.f32 %v1395_v9, %v1395_v9  ;;  %v379_v19 = vmul.f32 %v1398_v10, %v1398_v10  ;;  %v1423_v20 = vld [vmem:[%s1356_s27 + $0x58] sm:$0xff]  ;;  %v380_v22 = vmul.f32 %v1407_v14, %v1407_v14  ;;  %v385_v27 = vmul.f32 0.75, %v372_v6 }
  0x99   : > { %v1426_v21 = vld [vmem:[%s1356_s27 + $0x60] sm:$0xff]  ;;  %v381_v23 = vmul.f32 %v1410_v15, %v1410_v15  ;;  %v382_v24 = vmul.f32 %v1413_v16, %v1413_v16  ;;  %v383_v25 = vmul.f32 %v1423_v20, %v1423_v20  ;;  %v386_v28 = vmul.f32 0.75, %v373_v7  ;;  %v360_v30 = vld [vmem:[%s1369_s9 + $0x8] sm:$0xff]  ;;  %v361_v34 = vld [vmem:[%s1369_s9 + $0x10] sm:$0xff] }
  0x9a   : > { %v384_v26 = vmul.f32 %v1426_v21, %v1426_v21  ;;  %v359_v29 = vld [vmem:[%s1369_s9] sm:$0xff]  ;;  %v387_v31 = vmul.f32 0.75, %v374_v11  ;;  %v388_v32 = vmul.f32 0.75, %v375_v12  ;;  %v389_v33 = vmul.f32 0.75, %v376_v13  ;;  %v1444_v35 = vld [vmem:[%s1369_s9 + $0x18] sm:$0xff]  ;;  %v364_v40 = vld [vmem:[%s1369_s9 + $0x28] sm:$0xff] }
  0x9b   : > { %953 = vlog2.f32 %v1379_v3  ;;  %v1447_v36 = vld [vmem:[%s1369_s9 + $0x20] sm:$0xff]  ;;  %v390_v37 = vmul.f32 0.75, %v377_v17  ;;  %v391_v38 = vmul.f32 0.75, %v378_v18  ;;  %v392_v39 = vmul.f32 0.75, %v379_v19  ;;  %v1452_v41 = vld [vmem:[%s1369_s9 + $0x30] sm:$0xff]  ;;  %v1455_v42 = vld [vmem:[%s1369_s9 + $0x38] sm:$0xff] }
  0x9c   : > { %955 = vlog2.f32 %v1382_v4  ;;  %v393_v43 = vmul.f32 0.75, %v380_v22  ;;  %v394_v44 = vmul.f32 0.75, %v381_v23  ;;  %v395_v45 = vmul.f32 0.75, %v382_v24  ;;  %v367_v46 = vld [vmem:[%s1369_s9 + $0x40] sm:$0xff]  ;;  %v368_v47 = vld [vmem:[%s1369_s9 + $0x48] sm:$0xff]  ;;  %v369_v48 = vld [vmem:[%s1369_s9 + $0x50] sm:$0xff] }
  0x9d   : > { %957 = vlog2.f32 %v1385_v5  ;;  %v396_v49 = vmul.f32 0.75, %v383_v25  ;;  %v397_v50 = vmul.f32 0.75, %v384_v26  ;;  %v398_v51 = vsub.f32 1.0, %v359_v29  ;;  %v370_v52 = vld [vmem:[%s1369_s9 + $0x58] sm:$0xff]  ;;  %v1466_v57 = vld [vmem:[%s1363_s25] sm:$0xff]  ;;  %v371_v58 = vld [vmem:[%s1369_s9 + $0x60] sm:$0xff] }
  0x9e   : > { %959 = vlog2.f32 %v1392_v8  ;;  %v399_v53 = vsub.f32 1.0, %v360_v30  ;;  %v400_v54 = vsub.f32 1.0, %v361_v34  ;;  %v401_v55 = vsub.f32 1.0, %v1444_v35  ;;  %1719 = vst [vmem:[#allocation13_spill] sm:$0xff] %v1466_v57  ;;  %v1473_v63 = vld [vmem:[%s1363_s25 + $0x8] sm:$0xff]  ;;  %v1479_v25 = vld [vmem:[%s1363_s25 + $0x10] sm:$0xff] }
  0x9f   : > { %v402_v59 = vsub.f32 1.0, %v1447_v36  ;;  %v403_v60 = vsub.f32 1.0, %v364_v40  ;;  %v404_v61 = vsub.f32 1.0, %v1452_v41  ;;  %v405_v62 = vsub.f32 1.0, %v1455_v42  ;;  %v1482_v26 = vld [vmem:[%s1363_s25 + $0x18] sm:$0xff]  ;;  %v1488_v18 = vld [vmem:[%s1363_s25 + $0x28] sm:$0xff] }
  0xa0   : > { %v406_v0 = vsub.f32 1.0, %v367_v46  ;;  %v407_v6 = vsub.f32 1.0, %v368_v47  ;;  %v408_v7 = vsub.f32 1.0, %v369_v48  ;;  %v424_v11 = vmul.f32 %v359_v29, %v1466_v57  ;;  %1720 = vst [vmem:[#allocation14_spill] sm:$0xff] %v1488_v18 }
  0xa1   : > { %v409_v12 = vsub.f32 1.0, %v370_v52  ;;  %v411_v13 = vmul.f32 %v398_v51, %v385_v27  ;;  %v425_v17 = vmul.f32 %v360_v30, %v1473_v63  ;;  %v410_v19 = vsub.f32 1.0, %v371_v58  ;;  %v1485_v30 = vld [vmem:[%s1363_s25 + $0x20] sm:$0xff] }
  0xa2   : > { %v412_v22 = vmul.f32 %v399_v53, %v386_v28  ;;  %v413_v23 = vmul.f32 %v400_v54, %v387_v31  ;;  %v414_v24 = vmul.f32 %v401_v55, %v388_v32  ;;  %v415_v29 = vmul.f32 %v402_v59, %v389_v33  ;;  %v1491_v28 = vld [vmem:[%s1363_s25 + $0x30] sm:$0xff]  ;;  %v1495_v33 = vld [vmem:[%s1363_s25 + $0x38] sm:$0xff] }
  0xa3   : > { %v416_v56 = vmul.f32 %v403_v60, %v390_v37  ;;  %v417_v57 = vmul.f32 %v404_v61, %v391_v38  ;;  %v418_v27 = vmul.f32 %v405_v62, %v392_v39  ;;  %v950_v51 = vpop.eup %949  ;;  %v419_v31 = vmul.f32 %v406_v0, %v393_v43  ;;  %v1498_v37 = vld [vmem:[%s1363_s25 + $0x40] sm:$0xff]  ;;  %v1501_v38 = vld [vmem:[%s1363_s25 + $0x48] sm:$0xff] }
  0xa4   : > { %v420_v32 = vmul.f32 %v407_v6, %v394_v44  ;;  %v421_v53 = vmul.f32 %v408_v7, %v395_v45  ;;  %v426_v54 = vmul.f32 %v361_v34, %v1479_v25  ;;  %v952_v55 = vpop.eup %951  ;;  %v422_v39 = vmul.f32 %v409_v12, %v396_v49  ;;  %v1509_v44 = vld [vmem:[%s1363_s25 + $0x50] sm:$0xff]  ;;  %v1512_v45 = vld [vmem:[%s1363_s25 + $0x58] sm:$0xff]  ;;  %v1515_v34 = vld [vmem:[%s1363_s25 + $0x60] sm:$0xff] }
  0xa5   : > { %v427_v59 = vmul.f32 %v1444_v35, %v1482_v26  ;;  %v428_v60 = vmul.f32 %v1447_v36, %v1485_v30  ;;  %v429_v43 = vmul.f32 %v364_v40, %v1488_v18  ;;  %v423_v61 = vmul.f32 %v410_v19, %v397_v50 }
  0xa6   : > { %v430_v62 = vmul.f32 %v1452_v41, %v1491_v28  ;;  %v431_v49 = vmul.f32 %v1455_v42, %v1495_v33  ;;  %v432_v35 = vmul.f32 %v367_v46, %v1498_v37  ;;  %v433_v36 = vmul.f32 %v368_v47, %v1501_v38 }
  0xa7   : > { %v434_v40 = vmul.f32 %v369_v48, %v1509_v44  ;;  %v435_v6 = vmul.f32 %v370_v52, %v1512_v45  ;;  %v436_v7 = vmul.f32 %v371_v58, %v1515_v34  ;;  %v1526_v18 = vadd.f32 %v424_v11, %v411_v13 }
  0xa8   : > { %v954_v0 = vpop.eup %953  ;;  %v1528_v50 = vadd.f32 %v425_v17, %v412_v22  ;;  %v1530_v41 = vadd.f32 %v426_v54, %v413_v23  ;;  %961 = vlog2.f32 %v1395_v9  ;;  %v1533_v46 = vadd.f32 %v427_v59, %v414_v24 }
  0xa9   : > { %v956_v12 = vpop.eup %955  ;;  %v1535_v19 = vadd.f32 %v428_v60, %v415_v29  ;;  %v1537_v47 = vadd.f32 %v429_v43, %v416_v56  ;;  %963 = vlog2.f32 %v1398_v10  ;;  %v1540_v52 = vadd.f32 %v430_v62, %v417_v57 }
  0xaa   : > { %v958_v42 = vpop.eup %957  ;;  %v1542_v58 = vadd.f32 %v431_v49, %v418_v27  ;;  %v1544_v11 = vadd.f32 %v432_v35, %v419_v31  ;;  %965 = vlog2.f32 %v1407_v14  ;;  %v1547_v13 = vadd.f32 %v433_v36, %v420_v32 }
  0xab   : > { %v960_v48 = vpop.eup %959  ;;  %v451_v17 = vmul.f32 0.6931472, %v950_v51  ;;  %v453_v22 = vmul.f32 0.6931472, %v952_v55  ;;  %967 = vlog2.f32 %v1410_v15  ;;  %v1550_v23 = vadd.f32 %v434_v40, %v421_v53 }
  0xac   : > { %v455_v56 = vmul.f32 0.6931472, %v954_v0  ;;  %v457_v24 = vmul.f32 0.6931472, %v956_v12  ;;  %969 = vlog2.f32 %v1413_v16  ;;  %v459_v57 = vmul.f32 0.6931472, %v958_v42 }
  0xad   : > { %v461_v29 = vmul.f32 0.6931472, %v960_v48  ;;  %971 = vlog2.f32 %v1423_v20  ;;  %v491_v27 = vsub.f32 1.0, %v1379_v3  ;;  %v1555_v31 = vadd.f32 %v435_v6, %v422_v39 }
  0xae   : > { %v1557_v32 = vadd.f32 %v436_v7, %v423_v61  ;;  %973 = vlog2.f32 %v1426_v21  ;;  %v492_v51 = vsub.f32 1.0, %v1382_v4  ;;  %v476_v53 = vmax.f32 %v451_v17, -100.0 }
  0xaf   : > { %v477_v54 = vmax.f32 %v453_v22, -100.0  ;;  %v493_v55 = vsub.f32 1.0, %v1385_v5  ;;  %v1721_v59 = vsub.f32 1.0, %v1373_v1  ;;  %v478_v60 = vmax.f32 %v455_v56, -100.0 }
  0xb0   : > { %v479_v43 = vmax.f32 %v457_v24, -100.0  ;;  %v494_v62 = vsub.f32 1.0, %v1392_v8  ;;  %v1722_v3 = vsub.f32 1.0, %v1376_v2  ;;  %v480_v39 = vmax.f32 %v459_v57, -100.0  ;;  %v1723_v2 = vld [vmem:[#allocation13_spill] sm:$0xff] }
  0xb1   : > { %975 = vlog2.f32 %v1721_v59  ;;  %v481_v61 = vmax.f32 %v461_v29, -100.0  ;;  %v495_v49 = vsub.f32 1.0, %v1395_v9  ;;  %v496_v4 = vsub.f32 1.0, %v1398_v10 }
  0xb2   : > { %977 = vlog2.f32 %v1722_v3  ;;  %v497_v35 = vsub.f32 1.0, %v1407_v14  ;;  %v498_v5 = vsub.f32 1.0, %v1410_v15  ;;  %v499_v1 = vsub.f32 1.0, %v1413_v16 }
  0xb3   : > { %979 = vlog2.f32 %v491_v27  ;;  %v500_v0 = vsub.f32 1.0, %v1423_v20  ;;  %v501_v8 = vsub.f32 1.0, %v1426_v21  ;;  %v1575_v36 = vmul.f32 %v476_v53, %v1723_v2  ;;  %v1724_v20 = vld [vmem:[#allocation14_spill] sm:$0xff] }
  0xb4   : > { %981 = vlog2.f32 %v492_v51  ;;  %v1578_v9 = vmul.f32 %v477_v54, %v1473_v63  ;;  %v1581_v10 = vmul.f32 %v478_v60, %v1479_v25  ;;  %v1584_v15 = vmul.f32 %v479_v43, %v1482_v26 }
  0xb5   : > { %983 = vlog2.f32 %v493_v55  ;;  %v962_v14 = vpop.eup %961  ;;  %v1587_v16 = vmul.f32 %v480_v39, %v1485_v30  ;;  %v1590_v21 = vmul.f32 %v481_v61, %v1724_v20  ;;  %v554_v7 = vsub.f32 1.0, %v1723_v2 }
  0xb6   : > { %985 = vlog2.f32 %v494_v62  ;;  %v964_v40 = vpop.eup %963  ;;  %v463_v6 = vmul.f32 0.6931472, %v962_v14  ;;  %v555_v12 = vsub.f32 1.0, %v1473_v63  ;;  %v556_v17 = vsub.f32 1.0, %v1479_v25 }
  0xb7   : > { %987 = vlog2.f32 %v495_v49  ;;  %v966_v42 = vpop.eup %965  ;;  %v465_v48 = vmul.f32 0.6931472, %v964_v40  ;;  %v557_v22 = vsub.f32 1.0, %v1482_v26  ;;  %v558_v57 = vsub.f32 1.0, %v1485_v30 }
  0xb8   : > { %989 = vlog2.f32 %v496_v4  ;;  %v968_v56 = vpop.eup %967  ;;  %v467_v24 = vmul.f32 0.6931472, %v966_v42  ;;  %v482_v59 = vmax.f32 %v463_v6, -100.0 }
  0xb9   : > { %991 = vlog2.f32 %v497_v35  ;;  %v970_v27 = vpop.eup %969  ;;  %v469_v51 = vmul.f32 0.6931472, %v968_v56  ;;  %v483_v62 = vmax.f32 %v465_v48, -100.0 }
  0xba   : > { %993 = vlog2.f32 %v498_v5  ;;  %v972_v54 = vpop.eup %971  ;;  %v471_v55 = vmul.f32 0.6931472, %v970_v27  ;;  %v484_v3 = vmax.f32 %v467_v24, -100.0  ;;  %v547_v48 = vmul.f32 %v482_v59, %v1491_v28 }
  0xbb   : > { %995 = vlog2.f32 %v499_v1  ;;  %v974_v60 = vpop.eup %973  ;;  %v473_v43 = vmul.f32 0.6931472, %v972_v54  ;;  %v485_v49 = vmax.f32 %v469_v51, -100.0  ;;  %v548_v51 = vmul.f32 %v483_v62, %v1495_v33 }
  0xbc   : > { %997 = vlog2.f32 %v500_v0  ;;  %v475_v61 = vmul.f32 0.6931472, %v974_v60  ;;  %v486_v4 = vmax.f32 %v471_v55, -100.0  ;;  %v549_v54 = vmul.f32 %v484_v3, %v1498_v37 }
  0xbd   : > { %999 = vlog2.f32 %v501_v8  ;;  %v487_v1 = vmax.f32 %v473_v43, -100.0 }
  0xbe   : > { %v976_v39 = vpop.eup %975  ;;  %v488_v6 = vmax.f32 %v475_v61, -100.0  ;;  %v551_v0 = vmul.f32 %v486_v4, %v1509_v44 }
  0xbf   : > { %v978_v5 = vpop.eup %977  ;;  %v503_v2 = vmul.f32 0.6931472, %v976_v39  ;;  %v550_v39 = vmul.f32 %v485_v49, %v1501_v38  ;;  %v552_v59 = vmul.f32 %v487_v1, %v1512_v45 }
  0xc0   : > { %v980_v40 = vpop.eup %979  ;;  %v505_v42 = vmul.f32 0.6931472, %v978_v5  ;;  %v553_v62 = vmul.f32 %v488_v6, %v1515_v34 }
  0xc1   : > { %v982_v56 = vpop.eup %981  ;;  %v507_v24 = vmul.f32 0.6931472, %v980_v40  ;;  %v528_v27 = vmax.f32 %v503_v2, -100.0 }
  0xc2   : > { %v984_v55 = vpop.eup %983  ;;  %v509_v60 = vmul.f32 0.6931472, %v982_v56  ;;  %v529_v43 = vmax.f32 %v505_v42, -100.0 }
  0xc3   : > { %v986_v61 = vpop.eup %985  ;;  %v511_v5 = vmul.f32 0.6931472, %v984_v55  ;;  %v530_v14 = vmax.f32 %v507_v24, -100.0  ;;  %v567_v8 = vmul.f32 %v554_v7, %v528_v27 }
  0xc4   : > { %v988_v35 = vpop.eup %987  ;;  %v513_v40 = vmul.f32 0.6931472, %v986_v61  ;;  %v531_v2 = vmax.f32 %v509_v60, -100.0  ;;  %v568_v25 = vmul.f32 %v555_v12, %v529_v43 }
  0xc5   : > { %v990_v3 = vpop.eup %989  ;;  %v515_v63 = vmul.f32 0.6931472, %v988_v35  ;;  %v532_v56 = vmax.f32 %v511_v5, -100.0  ;;  %v569_v42 = vmul.f32 %v556_v17, %v530_v14  ;;  %v580_v49 = vadd.f32 %v567_v8, %v1575_v36 }
  0xc6   : > { %v992_v53 = vpop.eup %991  ;;  %v517_v4 = vmul.f32 0.6931472, %v990_v3  ;;  %v533_v29 = vmax.f32 %v513_v40, -100.0  ;;  %v570_v24 = vmul.f32 %v557_v22, %v531_v2  ;;  %v581_v7 = vadd.f32 %v568_v25, %v1578_v9 }
  0xc7   : > { %v994_v1 = vpop.eup %993  ;;  %v519_v27 = vmul.f32 0.6931472, %v992_v53  ;;  %v534_v55 = vmax.f32 %v515_v63, -100.0  ;;  %v571_v12 = vmul.f32 %v558_v57, %v532_v56  ;;  %v582_v35 = vadd.f32 %v569_v42, %v1581_v10 }
  0xc8   : > { %v996_v6 = vpop.eup %995  ;;  %v521_v17 = vmul.f32 0.6931472, %v994_v1  ;;  %v535_v14 = vmax.f32 %v517_v4, -100.0  ;;  %v1725_v36 = vsub.f32 1.0, %v1724_v20  ;;  %v583_v60 = vadd.f32 %v570_v24, %v1584_v15 }
  0xc9   : > { %v998_v26 = vpop.eup %997  ;;  %v523_v22 = vmul.f32 0.6931472, %v996_v6  ;;  %v536_v43 = vmax.f32 %v519_v27, -100.0  ;;  %v1726_v9 = vsub.f32 1.0, %v1491_v28  ;;  %v584_v63 = vadd.f32 %v571_v12, %v1587_v16 }
  0xca   : > { %v572_v8 = vmul.f32 %v1725_v36, %v533_v29  ;;  %v1000_v30 = vpop.eup %999  ;;  %v525_v57 = vmul.f32 0.6931472, %v998_v26  ;;  %v537_v25 = vmax.f32 %v521_v17, -100.0  ;;  %v1727_v10 = vsub.f32 1.0, %v1495_v33 }
  0xcb   : > { %v573_v53 = vmul.f32 %v1726_v9, %v534_v55  ;;  %v527_v20 = vmul.f32 0.6931472, %v1000_v30  ;;  %v538_v29 = vmax.f32 %v523_v22, -100.0  ;;  %v1728_v15 = vsub.f32 1.0, %v1498_v37 }
  0xcc   : > { %v574_v61 = vmul.f32 %v1727_v10, %v535_v14  ;;  %v585_v5 = vadd.f32 %v572_v8, %v1590_v21  ;;  %v539_v3 = vmax.f32 %v525_v57, -100.0  ;;  %v1729_v28 = vsub.f32 1.0, %v1501_v38 }
  0xcd   : > { %v575_v40 = vmul.f32 %v1728_v15, %v536_v43  ;;  %v586_v2 = vadd.f32 %v573_v53, %v547_v48  ;;  %v593_v16 = vsub.f32 0.0, %v580_v49  ;;  %v540_v4 = vmax.f32 %v527_v20, -100.0 }
  0xce   : > { %v576_v56 = vmul.f32 %v1729_v28, %v537_v25  ;;  %v587_v42 = vadd.f32 %v574_v61, %v548_v51  ;;  %v1730_v24 = vsub.f32 1.0, %v1509_v44  ;;  %v594_v27 = vsub.f32 0.0, %v581_v7 }
  0xcf   : > { %v588_v33 = vadd.f32 %v575_v40, %v549_v54  ;;  %v1731_v21 = vsub.f32 1.0, %v1512_v45  ;;  %v595_v6 = vsub.f32 0.0, %v582_v35  ;;  %v596_v37 = vsub.f32 0.0, %v583_v60 }
  0xd0   : > { %v577_v1 = vmul.f32 %v1730_v24, %v538_v29  ;;  %v589_v12 = vadd.f32 %v576_v56, %v550_v39  ;;  %v1732_v48 = vsub.f32 1.0, %v1515_v34  ;;  %v597_v38 = vsub.f32 0.0, %v584_v63 }
  0xd1   : > { %v578_v55 = vmul.f32 %v1731_v21, %v539_v3  ;;  %v598_v36 = vsub.f32 0.0, %v585_v5  ;;  %v599_v49 = vsub.f32 0.0, %v586_v2  ;;  %v600_v8 = vsub.f32 0.0, %v587_v42 }
  0xd2   : > { %v579_v17 = vmul.f32 %v1732_v48, %v540_v4  ;;  %v590_v14 = vadd.f32 %v577_v1, %v551_v0  ;;  %v601_v26 = vsub.f32 0.0, %v588_v33  ;;  %v602_v22 = vsub.f32 0.0, %v589_v12 }
  0xd3   : > { %v591_v51 = vadd.f32 %v578_v55, %v552_v59  ;;  %v606_v7 = vmul.f32 %v593_v16, %v1526_v18  ;;  %v607_v39 = vmul.f32 %v594_v27, %v1528_v50  ;;  %v608_v35 = vmul.f32 %v595_v6, %v1530_v41 }
  0xd4   : > { %v592_v44 = vadd.f32 %v579_v17, %v553_v62  ;;  %v603_v54 = vsub.f32 0.0, %v590_v14  ;;  %v609_v34 = vmul.f32 %v596_v37, %v1533_v46  ;;  %v610_v0 = vmul.f32 %v597_v38, %v1535_v19  ;;  %624 = sbr.rel (%p868_p7) target bundleno = 244 (0xf4), region = 52 }
  0xd5   : > { %v604_v45 = vsub.f32 0.0, %v591_v51  ;;  %v1644_v59 = vmul.f32 %v598_v36, %v1537_v47  ;;  %v1647_v43 = vmul.f32 %v599_v49, %v1540_v52  ;;  %v1650_v62 = vmul.f32 %v600_v8, %v1542_v58 }
  0xd6   : > { %v605_v60 = vsub.f32 0.0, %v592_v44  ;;  %v1653_v18 = vmul.f32 %v601_v26, %v1544_v11  ;;  %v1656_v50 = vmul.f32 %v602_v22, %v1547_v13  ;;  %v1659_v41 = vmul.f32 %v603_v54, %v1550_v23 }
  0xd7   : > { %v1662_v46 = vmul.f32 %v604_v45, %v1555_v31 }
  0xd8   : > { %v1665_v19 = vmul.f32 %v605_v60, %v1557_v32 }
  0xd9   : > { %v626_v47 = vadd.f32 %v607_v39, %v606_v7  ;;  %v625_v30 = vld [vmem:[#allocation2] sm:$0xff] }
  0xdb   : > { %v627_v52 = vadd.f32 %v626_v47, %v608_v35 }
  0xdd   : > { %v628_v58 = vadd.f32 %v627_v52, %v609_v34 }
  0xdf   : > { %v629_v11 = vadd.f32 %v628_v58, %v610_v0 }
  0xe1   : > { %v630_v9 = vadd.f32 %v629_v11, %v1644_v59 }
  0xe3   : > { %v631_v13 = vadd.f32 %v630_v9, %v1647_v43 }
  0xe5   : > { %v632_v23 = vadd.f32 %v631_v13, %v1650_v62 }
  0xe7   : > { %v633_v53 = vadd.f32 %v632_v23, %v1653_v18 }
  0xe9   : > { %v634_v31 = vadd.f32 %v633_v53, %v1656_v50 }
  0xeb   : > { %v635_v32 = vadd.f32 %v634_v31, %v1659_v41 }
  0xed   : > { %v636_v63 = vadd.f32 %v635_v32, %v1662_v46 }
  0xef   : > { %v637_v57 = vadd.f32 %v636_v63, %v1665_v19 }
  0xf1   : > { %v638_v25 = vadd.f32 %v637_v57, %v625_v30 }
  0xf3   : > { %639 = vst [vmem:[#allocation2] sm:$0xff] %v638_v25 }
  0xf4 PF: > { %p869_p4 = scmp.lt.s32.totalorder %s1139_s15, 1 }
  0xf5   : > { %s644_s23 = smul.u32 (!%p869_p4), 104, %s1139_s15 }
  0xf6   : > { %643 = sbr.rel (%p869_p4) target bundleno = 288 (0x120), region = 56 }
  0xfb   : > { %v645_v10 = vlaneseq  ;;  %v659_v29 = vstv %s644_s23  ;;  %v699_v53 = vld [vmem:[#allocation2] sm:$0xff] }
  0xfd   : > { %v646_v61 = vshrl.u32 %v645_v10, 7 }
  0xff   : > { %v647_v5 = vadd.s32 8, %v646_v61  ;;  %v648_v20 = vadd.s32 16, %v646_v61  ;;  %v649_v15 = vadd.s32 24, %v646_v61  ;;  %v660_v40 = vadd.s32 %v659_v29, %v646_v61 }
 0x100   : > { %v650_v3 = vadd.s32 32, %v646_v61  ;;  %v651_v56 = vadd.s32 40, %v646_v61  ;;  %v652_v16 = vadd.s32 48, %v646_v61  ;;  %v653_v33 = vadd.s32 56, %v646_v61 }
 0x101   : > { %v661_v2 = vadd.s32 %v659_v29, %v647_v5  ;;  %v662_v28 = vadd.s32 %v659_v29, %v648_v20  ;;  %v663_v42 = vadd.s32 %v659_v29, %v649_v15  ;;  %vm673_vm0 = vcmp.lt.s32.totalorder %v660_v40, 105 }
 0x102   : > { %v664_v4 = vadd.s32 %v659_v29, %v650_v3  ;;  %v686_v24 = vsel %vm673_vm0, %v606_v7, 0.0  ;;  %v665_v27 = vadd.s32 %v659_v29, %v651_v56  ;;  %v654_v55 = vadd.s32 64, %v646_v61 }
 0x103   : > { %vm674_vm1 = vcmp.lt.s32.totalorder %v661_v2, 105  ;;  %vm675_vm2 = vcmp.lt.s32.totalorder %v662_v28, 105  ;;  %vm676_vm3 = vcmp.lt.s32.totalorder %v663_v42, 105  ;;  %v666_v12 = vadd.s32 %v659_v29, %v652_v16 }
 0x104   : > { %v687_v1 = vsel %vm674_vm1, %v607_v39, 0.0  ;;  %v688_v21 = vsel %vm675_vm2, %v608_v35, 0.0  ;;  %vm677_vm4 = vcmp.lt.s32.totalorder %v664_v4, 105  ;;  %v689_v37 = vsel %vm676_vm3, %v609_v34, 0.0 }
 0x105   : > { %v700_v6 = vadd.f32 %v687_v1, %v686_v24  ;;  %v655_v48 = vadd.s32 72, %v646_v61  ;;  %v667_v17 = vadd.s32 %v659_v29, %v653_v33  ;;  %vm678_vm5 = vcmp.lt.s32.totalorder %v665_v27, 105 }
 0x106   : > { %v690_v38 = vsel %vm677_vm4, %v610_v0, 0.0  ;;  %v656_v36 = vadd.s32 80, %v646_v61  ;;  %v668_v51 = vadd.s32 %v659_v29, %v654_v55  ;;  %vm679_vm6 = vcmp.lt.s32.totalorder %v666_v12, 105 }
 0x107   : > { %v701_v14 = vadd.f32 %v700_v6, %v688_v21  ;;  %v691_v8 = vsel %vm678_vm5, %v1644_v59, 0.0  ;;  %v657_v26 = vadd.s32 88, %v646_v61  ;;  %v669_v44 = vadd.s32 %v659_v29, %v655_v48 }
 0x108   : > { %vm680_vm7 = vcmp.lt.s32.totalorder %v667_v17, 105  ;;  %v692_v54 = vsel %vm679_vm6, %v1647_v43, 0.0  ;;  %v658_v7 = vadd.s32 96, %v646_v61  ;;  %v670_v45 = vadd.s32 %v659_v29, %v656_v36 }
 0x109   : > { %v702_v49 = vadd.f32 %v701_v14, %v689_v37  ;;  %vm681_vm8 = vcmp.lt.s32.totalorder %v668_v51, 105  ;;  %v693_v35 = vsel %vm680_vm7, %v1650_v62, 0.0  ;;  %v671_v34 = vadd.s32 %v659_v29, %v657_v26 }
 0x10a   : > { %vm682_vm9 = vcmp.lt.s32.totalorder %v669_v44, 105  ;;  %v694_v0 = vsel %vm681_vm8, %v1653_v18, 0.0  ;;  %v672_v47 = vadd.s32 %v659_v29, %v658_v7  ;;  %vm683_vm10 = vcmp.lt.s32.totalorder %v670_v45, 105 }
 0x10b   : > { %v703_v22 = vadd.f32 %v702_v49, %v690_v38  ;;  %v695_v52 = vsel %vm682_vm9, %v1656_v50, 0.0  ;;  %vm684_vm11 = vcmp.lt.s32.totalorder %v671_v34, 105  ;;  %v696_v43 = vsel %vm683_vm10, %v1659_v41, 0.0 }
 0x10c   : > { %vm685_vm12 = vcmp.lt.s32.totalorder %v672_v47, 105  ;;  %v697_v9 = vsel %vm684_vm11, %v1662_v46, 0.0 }
 0x10d   : > { %v704_v39 = vadd.f32 %v703_v22, %v691_v8  ;;  %v698_v62 = vsel %vm685_vm12, %v1665_v19, 0.0 }
 0x10f   : > { %v705_v60 = vadd.f32 %v704_v39, %v692_v54 }
 0x111   : > { %v706_v59 = vadd.f32 %v705_v60, %v693_v35 }
 0x113   : > { %v707_v58 = vadd.f32 %v706_v59, %v694_v0 }
 0x115   : > { %v708_v11 = vadd.f32 %v707_v58, %v695_v52 }
 0x117   : > { %v709_v13 = vadd.f32 %v708_v11, %v696_v43 }
 0x119   : > { %v710_v23 = vadd.f32 %v709_v13, %v697_v9 }
 0x11b   : > { %v711_v31 = vadd.f32 %v710_v23, %v698_v62 }
 0x11d   : > { %v712_v18 = vadd.f32 %v711_v31, %v699_v53 }
 0x11f   : > { %713 = vst [vmem:[#allocation2] sm:$0xff] %v712_v18 }
 0x120 PF: > { %p870_p5 = scmp.ne.s32.totalorder %s1139_s15, 1 }
 0x122   : > { %717 = sbr.rel (%p870_p5) target bundleno = 497 (0x1f1), region = 60 }
 0x127   : > { %v718_v50 = vld [vmem:[#allocation2] sm:$0xff] }
 0x128   : > { %719 = vadd.xlane.f32.xlu0 %v718_v50 }
 0x1b1   : > { %v720_v32 = vpop.xlane.xlu0 %719 }
 0x1b2   : > { %v721_v41 = vrot.slane %v720_v32, 4 }
 0x1b4   : > { %v722_v63 = vadd.f32 %v721_v41, %v720_v32 }
 0x1b6   : > { %v723_v30 = vrot.slane %v722_v63, 2 }
 0x1b8   : > { %v724_v57 = vadd.f32 %v723_v30, %v722_v63 }
 0x1ba   : > { %v725_v46 = vrot.slane %v724_v57, 1 }
 0x1bc   : > { %v726_v25 = vadd.f32 %v725_v46, %v724_v57 }
 0x1be   : > { %882 = vpush %v726_v25 }
 0x1ef   : > { %s883_s11 = spop %882 }
 0x1f0   : > { %729 = sst [smem:[#allocation9]] %s883_s11 }
 0x1f1 PF: > { %p891_p6 = scmp.eq.s32.totalorder %s1209_s18, 1  ;;  %s1159_s12 = smov [#allocation9]  }
 0x1f3   : > { %888 = dma.smem_to_hbm (%p891_p6), %s1159_s12, 16, %s1712_s3, [#allocation5]  }
 0x1f4   : > { %1122 = dma.done.wait (%p891_p6), [#allocation5], 16  }
 0x1f5   : > { %1124 = vsyncadd (%p891_p6), [#allocation5], 4294967280 }
 0x1f6   : > { %745 = sfence }
 0x1f7 PF: > { %s20_s17 = sadd.s32 1, %s1147_s17   ;;  %s1733_s12 = smov %s1131_s13 }
 0x1f8   : > { %p17_p8 = scmp.ge.s32.totalorder %s20_s17, 4   ;;  %s1734_s13 = smov %s1135_s14 }
 0x1f9   : > { %s1735_s14 = smov %s1231_s24  ;;  %s1736_s15 = smov %s1143_s16 }
 0x1fa   : > { %s1737_s16 = smov %s1739_s19  ;;  %19 = sbr.rel (!%p17_p8) target bundleno = 7 (0x7), region = 111 }
 0x1ff   :  { %751 = vsyncpa [#allocation4], 1 }
 0x200   :  { %753 = vsyncpa [#allocation4 + $0x1], 1 }
 0x201   :  { %754 = vsyncpa [#allocation7], 1 }
 0x202   :  { %756 = vsyncpa [#allocation7 + $0x1], 1 }
 0x203   :  { %757 = vsyncpa [#allocation5], 1 }
 0x204   :  { %759 = vsyncpa [#allocation5 + $0x1], 1 }

</bundles_post_ra>
